<compile_context>
chip_gen: v7x
topology: tpu7x:2x2x1
jax: 0.10.0
libtpu: 0.0.40
codegen_flags: <defaults>
</compile_context>

<pallas_src>
import functools

import jax
import jax.numpy as jnp
from jax import lax
from jax.experimental import pallas as pl
from jax.experimental.pallas import tpu as pltpu

LANE = 128


def _round_up(x, m):
    return ((x + m - 1) // m) * m


def _choose_tb(bsz):
    """Largest power-of-two tile <= min(2048, bsz // 2), floored at 8 rows."""
    cap = min(2048, max(bsz // 2, 8))
    tb = 8
    while tb * 2 <= cap:
        tb *= 2
    return tb


# ------------------------------ fused kernel --------------------------------

def _maddpg_critic_kernel(state_ref, act_ref, wenc_ref, benc_ref,
                          w1e_ref, w1s_ref, w1a_ref, b1_ref,
                          w2_ref, b2_ref, w3blk_ref, b3_ref, q_ref):
    s = state_ref[...]        # (tb, state_dim)   state features on lanes
    a = act_ref[...]          # (tb, act_dim)     flattened joint actions

    # Per-agent encoder as one block-diagonal matmul + ReLU (no (B,A,L) reshapes).
    enc = jnp.maximum(
        jnp.dot(s, wenc_ref[...], preferred_element_type=jnp.float32)
        + benc_ref[...],
        0.0,
    )

    # fc1: accumulate encoder + state(isolate) + action contributions; the
    # concatenated fc1 input vector is never materialized.
    h = jnp.dot(enc, w1e_ref[...], preferred_element_type=jnp.float32)
    h = h + jnp.dot(s, w1s_ref[...], preferred_element_type=jnp.float32)
    h = h + jnp.dot(a, w1a_ref[...], preferred_element_type=jnp.float32)
    h = jnp.maximum(h + b1_ref[...], 0.0)

    # fc2
    h = jnp.maximum(
        jnp.dot(h, w2_ref[...], preferred_element_type=jnp.float32)
        + b2_ref[...],
        0.0,
    )

    # fc3 (out_features == 1), produced lane-dense: row 0 of w3blk holds w3, so
    # a trans-B matmul gives an (8, tb) result whose row 0 is q for the tile.
    q8 = lax.dot_general(w3blk_ref[...], h, (((1,), (1,)), ((), ())),
                         preferred_element_type=jnp.float32)
    q_ref[...] = q8[0:1, :] + b3_ref[0, 0]


@functools.partial(jax.jit, static_argnames=("act_dim", "tb"))
def _fused_forward(inputs, actions, wenc, benc, w1e, w1s, w1a, b1, w2, b2,
                   w3blk, b3, *, act_dim, tb):
    inputs = inputs.astype(jnp.float32)
    act_flat = jnp.reshape(actions, (-1, act_dim)).astype(jnp.float32)
    bsz, state_dim = inputs.shape
    num_tiles = pl.cdiv(bsz, tb)
    fp_enc = wenc.shape[1]
    fp_h = w2.shape[1]

    q = pl.pallas_call(
        _maddpg_critic_kernel,
        out_shape=jax.ShapeDtypeStruct((num_tiles, tb), jnp.float32),
        grid_spec=pltpu.PrefetchScalarGridSpec(
            num_scalar_prefetch=0,
            grid=(num_tiles,),
            in_specs=[
                pl.BlockSpec((tb, state_dim), lambda i: (i, 0)),   # state slab
                pl.BlockSpec((tb, act_dim), lambda i: (i, 0)),     # actions slab
                pl.BlockSpec((state_dim, fp_enc), lambda i: (0, 0)),  # W_enc (blk-diag)
                pl.BlockSpec((1, fp_enc), lambda i: (0, 0)),          # b_enc
                pl.BlockSpec((fp_enc, fp_h), lambda i: (0, 0)),       # W1 (enc rows)
                pl.BlockSpec((state_dim, fp_h), lambda i: (0, 0)),    # W1 (state rows)
                pl.BlockSpec((act_dim, fp_h), lambda i: (0, 0)),      # W1 (action rows)
                pl.BlockSpec((1, fp_h), lambda i: (0, 0)),            # b1
                pl.BlockSpec((fp_h, fp_h), lambda i: (0, 0)),         # W2
                pl.BlockSpec((1, fp_h), lambda i: (0, 0)),            # b2
                pl.BlockSpec((8, fp_h), lambda i: (0, 0)),            # W3 (row 0)
                pl.BlockSpec((1, 1), lambda i: (0, 0),
                             memory_space=pltpu.MemorySpace.SMEM),    # b3 scalar
            ],
            out_specs=pl.BlockSpec((1, tb), lambda i: (i, 0)),        # lane-dense q
        ),
        compiler_params=pltpu.CompilerParams(
            dimension_semantics=("parallel",)),
    )(inputs, act_flat, wenc, benc, w1e, w1s, w1a, b1, w2, b2, w3blk, b3)

    # (num_tiles, tb) lane-dense -> (bsz, 1); trailing garbage entries of the
    # ragged final tile are sliced off here.
    return jnp.reshape(q, (-1,))[:bsz][:, None]


# ----------------------------- Module wrapper --------------------------------

class MADDPGCriticPallas:
    """JAX/Pallas re-implementation of MADDPGCritic.forward."""

    def __init__(self, scheme, args, use_encoder=True, key=None):
        self.n_actions = args["n_actions"]
        self.n_agents = args["n_agents"]
        self.rnn_hidden_dim = args["rnn_hidden_dim"]
        self.obs_shape = scheme["obs"]["vshape"]
        self.state_shape = scheme["state"]["vshape"]
        self.isolate_dim = 4
        self.encode_out_dim = 16
        self.use_encoder = use_encoder
        if use_encoder:
            assert self.state_shape == self.n_agents * self.obs_shape
            self.input_shape = ((self.encode_out_dim + self.n_actions)
                                * self.n_agents + self.isolate_dim)
        else:
            self.input_shape = self.state_shape + self.n_actions * self.n_agents

        if key is None:
            key = jax.random.PRNGKey(0)
        ks = jax.random.split(key, 4)

        def linear_init(k, fan_in, fan_out):
            kw, kb = jax.random.split(k)
            bound = 1.0 / float(fan_in) ** 0.5
            w = jax.random.uniform(kw, (fan_in, fan_out), jnp.float32, -bound, bound)
            b = jax.random.uniform(kb, (1, fan_out), jnp.float32, -bound, bound)
            return w, b

        obs_trim = self.obs_shape - self.isolate_dim
        # encoder (approximation, see TODO at top of file)
        self.w_enc, self.b_enc = linear_init(ks[0], obs_trim, self.encode_out_dim)
        # fc1 / fc2 / fc3 (stored (in_dim, out_dim) -> kernel computes x @ W + b)
        self.w1, self.b1 = linear_init(ks[1], self.input_shape, self.rnn_hidden_dim)
        self.w2, self.b2 = linear_init(ks[2], self.rnn_hidden_dim, self.rnn_hidden_dim)
        self.w3, self.b3 = linear_init(ks[3], self.rnn_hidden_dim, 1)

        self._build_padded_params()

    def _build_padded_params(self):
        A, E, H = self.n_agents, self.encode_out_dim, self.rnn_hidden_dim
        S = self.state_shape
        ACT = self.n_agents * self.n_actions
        AE = A * E
        iso = self.isolate_dim
        obs_trim = self.obs_shape - iso

        self.fp_enc = _round_up(max(AE, 1), LANE)
        self.fp_h = _round_up(H, LANE)

        wenc = jnp.zeros((S, self.fp_enc), jnp.float32)
        benc = jnp.zeros((1, self.fp_enc), jnp.float32)
        w1e = jnp.zeros((self.fp_enc, self.fp_h), jnp.float32)
        w1s = jnp.zeros((S, self.fp_h), jnp.float32)
        w1a = jnp.zeros((ACT, self.fp_h), jnp.float32)
        if self.use_encoder:
            # Block-diagonal encoder weight: agent a's trimmed obs lanes map to
            # agent a's encoder output columns; its isolate lanes stay zero.
            for a in range(A):
                r0 = a * self.obs_shape
                c0 = a * E
                wenc = wenc.at[r0:r0 + obs_trim, c0:c0 + E].set(self.w_enc)
                benc = benc.at[:, c0:c0 + E].set(self.b_enc)
            w1e = w1e.at[:AE, :H].set(self.w1[:AE])
            # fc1 rows for the isolate dims sit at the last `iso` state lanes.
            w1s = w1s.at[S - iso:S, :H].set(self.w1[AE:AE + iso])
            w1a = w1a.at[:, :H].set(self.w1[AE + iso:])
        else:
            w1s = w1s.at[:, :H].set(self.w1[:S])
            w1a = w1a.at[:, :H].set(self.w1[S:])

        b1p = jnp.zeros((1, self.fp_h), jnp.float32).at[:, :H].set(self.b1)
        w2p = jnp.zeros((self.fp_h, self.fp_h), jnp.float32).at[:H, :H].set(self.w2)
        b2p = jnp.zeros((1, self.fp_h), jnp.float32).at[:, :H].set(self.b2)
        # fc3 weight as row 0 of an (8, fp_h) block -> aligned trans-B matmul.
        w3blk = jnp.zeros((8, self.fp_h), jnp.float32).at[0, :H].set(self.w3[:, 0])
        b3 = jnp.reshape(self.b3, (1, 1)).astype(jnp.float32)
        self._padded = (wenc, benc, w1e, w1s, w1a, b1p, w2p, b2p, w3blk, b3)

    def forward(self, inputs, actions, hidden_state=None):
        if actions is None:
            # TODO(synk): actions=None branch unsupported (fc1 width needs actions).
            raise NotImplementedError("actions must be provided")
        bsz = int(inputs.shape[0])
        tb = _choose_tb(bsz)
        q = _fused_forward(
            inputs, actions, *self._padded,
            act_dim=self.n_actions * self.n_agents, tb=tb)
        return q, hidden_state


# ------------------------------- reference -----------------------------------

def _forward_ref(critic, inputs, actions):
    """Pure-jnp reference of the same (unpadded) math."""
    bsz = inputs.shape[0]
    x = inputs
    if critic.use_encoder:
        obs3 = jnp.reshape(inputs, (bsz, critic.n_agents, critic.obs_shape))
        a = obs3[:, :, : -critic.isolate_dim]
        a = jnp.reshape(a, (bsz * critic.n_agents, -1))
        enc = jnp.maximum(a @ critic.w_enc + critic.b_enc, 0.0)
        enc = jnp.reshape(enc, (bsz, critic.n_agents * critic.encode_out_dim))
        x = jnp.concatenate([enc, inputs[:, -critic.isolate_dim:]], axis=1)
    act = jnp.reshape(actions, (-1, critic.n_actions * critic.n_agents))
    x = jnp.concatenate([x, act], axis=-1)
    h = jnp.maximum(x @ critic.w1 + critic.b1, 0.0)
    h = jnp.maximum(h @ critic.w2 + critic.b2, 0.0)
    return h @ critic.w3 + critic.b3


# --------------------------------- main ---------------------------------------

if __name__ == "__main__":
    n_agents = 3
    n_actions = 5
    obs_shape = 12            # per-agent obs; last 4 dims are the "isolate" dims
    state_shape = n_agents * obs_shape
    batch = 8

    scheme = {"state": {"vshape": state_shape}, "obs": {"vshape": obs_shape}}
    args = {"n_actions": n_actions, "n_agents": n_agents, "rnn_hidden_dim": 32}

    key = jax.random.PRNGKey(0)
    k_in, k_act, k_par, k_in2, k_act2, k_par2 = jax.random.split(key, 6)

    inputs = jax.random.normal(k_in, (batch, state_shape), jnp.float32)
    actions = jax.random.normal(k_act, (batch, n_agents, n_actions), jnp.float32)

    critic = MADDPGCriticPallas(scheme, args, use_encoder=True, key=k_par)

    # small batch (single tile)
    q, hidden = critic.forward(inputs, actions, hidden_state=None)
    q = jax.block_until_ready(q)
    assert q.shape == (batch, 1), q.shape
    q_ref = jax.block_until_ready(_forward_ref(critic, inputs, actions))
    assert jnp.allclose(q, q_ref, atol=1e-3, rtol=1e-3), (q, q_ref)

    # larger ragged batch -> multiple "parallel" grid tiles + ragged final block
    big = 1030
    inputs2 = jax.random.normal(k_in2, (big, state_shape), jnp.float32)
    actions2 = jax.random.normal(k_act2, (big, n_agents, n_actions), jnp.float32)
    q2, _ = critic.forward(inputs2, actions2)
    q2 = jax.block_until_ready(q2)
    assert q2.shape == (big, 1), q2.shape
    q2_ref = jax.block_until_ready(_forward_ref(critic, inputs2, actions2))
    assert jnp.allclose(q2, q2_ref, atol=1e-3, rtol=1e-3)

    # no-encoder variant (exercises the alternate fc1 weight mapping)
    critic2 = MADDPGCriticPallas(scheme, args, use_encoder=False, key=k_par2)
    q3, _ = critic2.forward(inputs, actions)
    q3 = jax.block_until_ready(q3)
    q3_ref = jax.block_until_ready(_forward_ref(critic2, inputs, actions))
    assert jnp.allclose(q3, q3_ref, atol=1e-3, rtol=1e-3)

    print("KERNEL_OK")
</pallas_src>

<mosaic_0001>
module attributes {stable_mosaic.version = 11 : i64} {
  func.func @_maddpg_critic_kernel(%arg0: i32, %arg1: memref<8x36xf32, #tpu.memory_space<vmem>>, %arg2: memref<8x15xf32, #tpu.memory_space<vmem>>, %arg3: memref<36x128xf32, #tpu.memory_space<vmem>>, %arg4: memref<1x128xf32, #tpu.memory_space<vmem>>, %arg5: memref<128x128xf32, #tpu.memory_space<vmem>>, %arg6: memref<36x128xf32, #tpu.memory_space<vmem>>, %arg7: memref<15x128xf32, #tpu.memory_space<vmem>>, %arg8: memref<1x128xf32, #tpu.memory_space<vmem>>, %arg9: memref<128x128xf32, #tpu.memory_space<vmem>>, %arg10: memref<1x128xf32, #tpu.memory_space<vmem>>, %arg11: memref<8x128xf32, #tpu.memory_space<vmem>>, %arg12: memref<1x1xf32, #tpu.memory_space<smem>>, %arg13: memref<1x8xf32, #tpu.memory_space<vmem>>) attributes {dimension_semantics = [#tpu.dimension_semantics<parallel>], iteration_bounds = array<i64: 1>, scalar_prefetch = 0 : i64, scratch_operands = 0 : i64, tpu.core_type = #tpu.core_type<tc>, window_params = [{transform_indices = @transform_0, window_bounds = array<i64: 8, 36>}, {transform_indices = @transform_1, window_bounds = array<i64: 8, 15>}, {pipeline_mode = #tpu.pipeline_mode<synchronous>, transform_indices = @transform_2, window_bounds = array<i64: 36, 128>}, {pipeline_mode = #tpu.pipeline_mode<synchronous>, transform_indices = @transform_3, window_bounds = array<i64: 1, 128>}, {pipeline_mode = #tpu.pipeline_mode<synchronous>, transform_indices = @transform_4, window_bounds = array<i64: 128, 128>}, {pipeline_mode = #tpu.pipeline_mode<synchronous>, transform_indices = @transform_5, window_bounds = array<i64: 36, 128>}, {pipeline_mode = #tpu.pipeline_mode<synchronous>, transform_indices = @transform_6, window_bounds = array<i64: 15, 128>}, {pipeline_mode = #tpu.pipeline_mode<synchronous>, transform_indices = @transform_7, window_bounds = array<i64: 1, 128>}, {pipeline_mode = #tpu.pipeline_mode<synchronous>, transform_indices = @transform_8, window_bounds = array<i64: 128, 128>}, {pipeline_mode = #tpu.pipeline_mode<synchronous>, transform_indices = @transform_9, window_bounds = array<i64: 1, 128>}, {pipeline_mode = #tpu.pipeline_mode<synchronous>, transform_indices = @transform_10, window_bounds = array<i64: 8, 128>}, {transform_indices = @transform_11, window_bounds = array<i64: 1, 1>}, {transform_indices = @transform_12, window_bounds = array<i64: 1, 8>}]} {
    %c0 = arith.constant 0 : index
    %c0_0 = arith.constant 0 : index
    %0 = vector.load %arg1[%c0, %c0_0] : memref<8x36xf32, #tpu.memory_space<vmem>>, vector<8x36xf32>
    %c0_1 = arith.constant 0 : index
    %c0_2 = arith.constant 0 : index
    %1 = vector.load %arg2[%c0_1, %c0_2] : memref<8x15xf32, #tpu.memory_space<vmem>>, vector<8x15xf32>
    %c0_3 = arith.constant 0 : index
    %c0_4 = arith.constant 0 : index
    %2 = vector.load %arg3[%c0_3, %c0_4] : memref<36x128xf32, #tpu.memory_space<vmem>>, vector<36x128xf32>
    %cst = arith.constant dense<0.000000e+00> : vector<8x128xf32>
    %3 = tpu.matmul %0, %2, %cst {dimension_numbers = #tpu.dot_dimension_numbers<[1], [0], [0], [1], [0, 0, 1, 1], [], []>} : vector<8x36xf32>, vector<36x128xf32>, vector<8x128xf32> -> vector<8x128xf32>
    %c0_5 = arith.constant 0 : index
    %c0_6 = arith.constant 0 : index
    %4 = vector.load %arg4[%c0_5, %c0_6] : memref<1x128xf32, #tpu.memory_space<vmem>>, vector<1x128xf32>
    %5 = vector.broadcast %4 : vector<1x128xf32> to vector<8x128xf32>
    %6 = arith.addf %3, %5 : vector<8x128xf32>
    %cst_7 = arith.constant 0.000000e+00 : f32
    %7 = vector.broadcast %cst_7 : f32 to vector<8x128xf32>
    %8 = arith.maximumf %6, %7 : vector<8x128xf32>
    %c0_8 = arith.constant 0 : index
    %c0_9 = arith.constant 0 : index
    %9 = vector.load %arg5[%c0_8, %c0_9] : memref<128x128xf32, #tpu.memory_space<vmem>>, vector<128x128xf32>
    %cst_10 = arith.constant dense<0.000000e+00> : vector<8x128xf32>
    %10 = tpu.matmul %8, %9, %cst_10 {dimension_numbers = #tpu.dot_dimension_numbers<[1], [0], [0], [1], [0, 0, 1, 1], [], []>} : vector<8x128xf32>, vector<128x128xf32>, vector<8x128xf32> -> vector<8x128xf32>
    %c0_11 = arith.constant 0 : index
    %c0_12 = arith.constant 0 : index
    %11 = vector.load %arg6[%c0_11, %c0_12] : memref<36x128xf32, #tpu.memory_space<vmem>>, vector<36x128xf32>
    %cst_13 = arith.constant dense<0.000000e+00> : vector<8x128xf32>
    %12 = tpu.matmul %0, %11, %cst_13 {dimension_numbers = #tpu.dot_dimension_numbers<[1], [0], [0], [1], [0, 0, 1, 1], [], []>} : vector<8x36xf32>, vector<36x128xf32>, vector<8x128xf32> -> vector<8x128xf32>
    %13 = arith.addf %10, %12 : vector<8x128xf32>
    %c0_14 = arith.constant 0 : index
    %c0_15 = arith.constant 0 : index
    %14 = vector.load %arg7[%c0_14, %c0_15] : memref<15x128xf32, #tpu.memory_space<vmem>>, vector<15x128xf32>
    %cst_16 = arith.constant dense<0.000000e+00> : vector<8x128xf32>
    %15 = tpu.matmul %1, %14, %cst_16 {dimension_numbers = #tpu.dot_dimension_numbers<[1], [0], [0], [1], [0, 0, 1, 1], [], []>} : vector<8x15xf32>, vector<15x128xf32>, vector<8x128xf32> -> vector<8x128xf32>
    %16 = arith.addf %13, %15 : vector<8x128xf32>
    %c0_17 = arith.constant 0 : index
    %c0_18 = arith.constant 0 : index
    %17 = vector.load %arg8[%c0_17, %c0_18] : memref<1x128xf32, #tpu.memory_space<vmem>>, vector<1x128xf32>
    %18 = vector.broadcast %17 : vector<1x128xf32> to vector<8x128xf32>
    %19 = arith.addf %16, %18 : vector<8x128xf32>
    %cst_19 = arith.constant 0.000000e+00 : f32
    %20 = vector.broadcast %cst_19 : f32 to vector<8x128xf32>
    %21 = arith.maximumf %19, %20 : vector<8x128xf32>
    %c0_20 = arith.constant 0 : index
    %c0_21 = arith.constant 0 : index
    %22 = vector.load %arg9[%c0_20, %c0_21] : memref<128x128xf32, #tpu.memory_space<vmem>>, vector<128x128xf32>
    %cst_22 = arith.constant dense<0.000000e+00> : vector<8x128xf32>
    %23 = tpu.matmul %21, %22, %cst_22 {dimension_numbers = #tpu.dot_dimension_numbers<[1], [0], [0], [1], [0, 0, 1, 1], [], []>} : vector<8x128xf32>, vector<128x128xf32>, vector<8x128xf32> -> vector<8x128xf32>
    %c0_23 = arith.constant 0 : index
    %c0_24 = arith.constant 0 : index
    %24 = vector.load %arg10[%c0_23, %c0_24] : memref<1x128xf32, #tpu.memory_space<vmem>>, vector<1x128xf32>
    %25 = vector.broadcast %24 : vector<1x128xf32> to vector<8x128xf32>
    %26 = arith.addf %23, %25 : vector<8x128xf32>
    %cst_25 = arith.constant 0.000000e+00 : f32
    %27 = vector.broadcast %cst_25 : f32 to vector<8x128xf32>
    %28 = arith.maximumf %26, %27 : vector<8x128xf32>
    %c0_26 = arith.constant 0 : index
    %c0_27 = arith.constant 0 : index
    %29 = vector.load %arg11[%c0_26, %c0_27] : memref<8x128xf32, #tpu.memory_space<vmem>>, vector<8x128xf32>
    %cst_28 = arith.constant dense<0.000000e+00> : vector<8x8xf32>
    %30 = tpu.matmul %29, %28, %cst_28 {dimension_numbers = #tpu.dot_dimension_numbers<[1], [1], [0], [0], [0, 0, 1, 0], [], []>} : vector<8x128xf32>, vector<8x128xf32>, vector<8x8xf32> -> vector<8x8xf32>
    %31 = vector.extract_strided_slice %30 {offsets = [0, 0], sizes = [1, 8], strides = [1, 1]} : vector<8x8xf32> to vector<1x8xf32>
    %c0_29 = arith.constant 0 : index
    %c0_30 = arith.constant 0 : index
    %32 = memref.load %arg12[%c0_29, %c0_30] : memref<1x1xf32, #tpu.memory_space<smem>>
    %33 = vector.broadcast %32 : f32 to vector<1x8xf32>
    %34 = arith.addf %31, %33 : vector<1x8xf32>
    %c0_31 = arith.constant 0 : index
    %c0_32 = arith.constant 0 : index
    %35 = vector.load %arg13[%c0_31, %c0_32] : memref<1x8xf32, #tpu.memory_space<vmem>>, vector<1x8xf32>
    tpu.vector_store %arg13[%c0_31, %c0_32], %34 {strides = array<i32>} : memref<1x8xf32, #tpu.memory_space<vmem>>, vector<1x8xf32>,
    return
  }
  func.func @transform_0(%arg0: i32) -> (i32, i32) {
    %c0_i32 = arith.constant 0 : i32
    %c0_i32_0 = arith.constant 0 : i32
    return %arg0, %c0_i32 : i32, i32
  }
  func.func @transform_1(%arg0: i32) -> (i32, i32) {
    %c0_i32 = arith.constant 0 : i32
    %c0_i32_0 = arith.constant 0 : i32
    return %arg0, %c0_i32 : i32, i32
  }
  func.func @transform_2(%arg0: i32) -> (i32, i32) {
    %c0_i32 = arith.constant 0 : i32
    %c0_i32_0 = arith.constant 0 : i32
    %c0_i32_1 = arith.constant 0 : i32
    return %c0_i32, %c0_i32_0 : i32, i32
  }
  func.func @transform_3(%arg0: i32) -> (i32, i32) {
    %c0_i32 = arith.constant 0 : i32
    %c0_i32_0 = arith.constant 0 : i32
    %c0_i32_1 = arith.constant 0 : i32
    return %c0_i32, %c0_i32_0 : i32, i32
  }
  func.func @transform_4(%arg0: i32) -> (i32, i32) {
    %c0_i32 = arith.constant 0 : i32
    %c0_i32_0 = arith.constant 0 : i32
    %c0_i32_1 = arith.constant 0 : i32
    return %c0_i32, %c0_i32_0 : i32, i32
  }
  func.func @transform_5(%arg0: i32) -> (i32, i32) {
    %c0_i32 = arith.constant 0 : i32
    %c0_i32_0 = arith.constant 0 : i32
    %c0_i32_1 = arith.constant 0 : i32
    return %c0_i32, %c0_i32_0 : i32, i32
  }
  func.func @transform_6(%arg0: i32) -> (i32, i32) {
    %c0_i32 = arith.constant 0 : i32
    %c0_i32_0 = arith.constant 0 : i32
    %c0_i32_1 = arith.constant 0 : i32
    return %c0_i32, %c0_i32_0 : i32, i32
  }
  func.func @transform_7(%arg0: i32) -> (i32, i32) {
    %c0_i32 = arith.constant 0 : i32
    %c0_i32_0 = arith.constant 0 : i32
    %c0_i32_1 = arith.constant 0 : i32
    return %c0_i32, %c0_i32_0 : i32, i32
  }
  func.func @transform_8(%arg0: i32) -> (i32, i32) {
    %c0_i32 = arith.constant 0 : i32
    %c0_i32_0 = arith.constant 0 : i32
    %c0_i32_1 = arith.constant 0 : i32
    return %c0_i32, %c0_i32_0 : i32, i32
  }
  func.func @transform_9(%arg0: i32) -> (i32, i32) {
    %c0_i32 = arith.constant 0 : i32
    %c0_i32_0 = arith.constant 0 : i32
    %c0_i32_1 = arith.constant 0 : i32
    return %c0_i32, %c0_i32_0 : i32, i32
  }
  func.func @transform_10(%arg0: i32) -> (i32, i32) {
    %c0_i32 = arith.constant 0 : i32
    %c0_i32_0 = arith.constant 0 : i32
    %c0_i32_1 = arith.constant 0 : i32
    return %c0_i32, %c0_i32_0 : i32, i32
  }
  func.func @transform_11(%arg0: i32) -> (i32, i32) {
    %c0_i32 = arith.constant 0 : i32
    %c0_i32_0 = arith.constant 0 : i32
    %c0_i32_1 = arith.constant 0 : i32
    return %c0_i32, %c0_i32_0 : i32, i32
  }
  func.func @transform_12(%arg0: i32) -> (i32, i32) {
    %c0_i32 = arith.constant 0 : i32
    %c0_i32_0 = arith.constant 0 : i32
    return %arg0, %c0_i32 : i32, i32
  }
}

</mosaic_0001>

<bundles_post_ra>
// kernel: _fused_forward.1
= control target key start
LH: loop header
LB: loop body
LE: loop exit
PB: predicated region body
PF: predicated region fallthrough
CT: control target
= control target key end

     0   :  { %18 = vsyncpa [#allocation4], 0  ;;  %s1175_s0 = inlined_call_operand.vmem [shape: f32[8,36], index: 0, kind: input, shape index: {}]   ;;  %s1176_s1 = inlined_call_operand.vmem [shape: f32[8,15], index: 1, kind: input, shape index: {}]   ;;  %s1177_s2 = inlined_call_operand.vmem [shape: f32[36,128], index: 2, kind: input, shape index: {}]   ;;  %s1178_s3 = inlined_call_operand.vmem [shape: f32[1,128], index: 3, kind: input, shape index: {}]   ;;  %s1179_s4 = inlined_call_operand.hbm [shape: f32[128,128], index: 4, kind: input, shape index: {}]   ;;  %s1180_s5 = inlined_call_operand.vmem [shape: f32[36,128], index: 5, kind: input, shape index: {}]   ;;  %s1181_s6 = inlined_call_operand.vmem [shape: f32[15,128], index: 6, kind: input, shape index: {}]   ;;  %s1182_s7 = inlined_call_operand.vmem [shape: f32[1,128], index: 7, kind: input, shape index: {}]   ;;  %s1183_s8 = inlined_call_operand.hbm [shape: f32[128,128], index: 8, kind: input, shape index: {}]   ;;  %s1184_s9 = inlined_call_operand.vmem [shape: f32[1,128], index: 9, kind: input, shape index: {}]   ;;  %s1185_s10 = inlined_call_operand.hbm [shape: f32[8,128], index: 10, kind: input, shape index: {}]   ;;  %s1186_s11 = inlined_call_operand.<no memory space> [shape: f32[1,1], index: 11, kind: input, shape index: {}]   ;;  %s1187_s12 = inlined_call_operand.hbm [shape: f32[1,8], index: 12, kind: output, shape index: {}]  }
   0x1   :  { %19 = vsyncpa [#allocation7], 0 }
   0x2   :  { %20 = vsyncpa [#allocation5], 0  ;;  %s951_s21 = smov [#allocation6]   ;;  %s952_s23 = smov [#allocation3]  }
   0x3   :  { %s52_s22 = sshll.u32 %s951_s21, 4  ;;  %s34_s24 = sshll.u32 %s952_s23, 4  ;;  %s53_s22 = int_to_ptr.vmem [resolvable:$true] %s52_s22  ;;  %s1026_s24 = int_to_ptr.vmem [resolvable:$true] %s34_s24 }
   0x4   :  { %s857_s27 = scalar_lea.hbm %s1183_s8, 2048 }
   0x5   :  { %p858_p0 = scmp.ne.s32.totalorder %s1183_s8, %s857_s27  ;;  %p861_p1 = scmp.lt.u32.totalorder %s857_s27, %s1183_s8 }
   0x7   :  { %p863_p2 = pnand %p861_p1, %p858_p0 }
   0x9   :  { %866 = shalt.err (!%p863_p2)
}
   0xa   :  { %s867_s14 = scalar_lea.vmem %s53_s22, 2048  ;;  %p872_p4 = scmp.lt.s32.totalorder %s53_s22, %s53_s22 }
   0xb   :  { %p868_p3 = scmp.ne.s32.totalorder %s53_s22, %s867_s14  ;;  %p873_p5 = scmp.lt.s32.totalorder %s867_s14, %s867_s14 }
   0xd   :  { %p874_p6 = por %p873_p5, %p872_p4 }
   0xf   :  { %p875_p7 = pnand %p874_p6, %p868_p3 }
  0x11   :  { %878 = shalt.err (!%p875_p7)
}
  0x12   :  { %s953_s15 = smov 128   ;;  %s954_s16 = smov 8  }
  0x13   :  { %58 = dma.hbm_to_vmem [thread:$0]  %s1183_s8, 2048, %s53_s22, [#allocation7], %s953_s15, %s953_s15, %s954_s16  }
  0x14   :  { %s879_s21 = scalar_lea.hbm %s1179_s4, 2048 }
  0x15   :  { %p880_p8 = scmp.ne.s32.totalorder %s1179_s4, %s879_s21  ;;  %p883_p9 = scmp.lt.u32.totalorder %s879_s21, %s1179_s4 }
  0x17   :  { %p885_p10 = pnand %p883_p9, %p880_p8 }
  0x19   :  { %888 = shalt.err (!%p885_p10)
}
  0x1a   :  { %s889_s28 = scalar_lea.vmem %s1026_s24, 2048  ;;  %p894_p12 = scmp.lt.s32.totalorder %s1026_s24, %s1026_s24 }
  0x1b   :  { %p890_p11 = scmp.ne.s32.totalorder %s1026_s24, %s889_s28  ;;  %p895_p13 = scmp.lt.s32.totalorder %s889_s28, %s889_s28 }
  0x1d   :  { %p896_p0 = por %p895_p13, %p894_p12 }
  0x1f   :  { %p897_p1 = pnand %p896_p0, %p890_p11 }
  0x21   :  { %900 = shalt.err (!%p897_p1)
}
  0x22   :  { %40 = dma.hbm_to_vmem [thread:$0]  %s1179_s4, 2048, %s1026_s24, [#allocation4], %s953_s15, %s953_s15, %s954_s16  }
  0x23   :  { %s955_s29 = smov [#allocation8]   ;;  %s901_s17 = scalar_lea.hbm %s1185_s10, 128 }
  0x24   :  { %s67_s30 = sshll.u32 %s955_s29, 4  ;;  %p902_p2 = scmp.ne.s32.totalorder %s1185_s10, %s901_s17  ;;  %s68_s30 = int_to_ptr.vmem [resolvable:$true] %s67_s30 }
  0x25   :  { %p905_p3 = scmp.lt.u32.totalorder %s901_s17, %s1185_s10 }
  0x27   :  { %p907_p4 = pnand %p905_p3, %p902_p2 }
  0x29   :  { %910 = shalt.err (!%p907_p4)
}
  0x2a   :  { %s911_s23 = scalar_lea.vmem %s68_s30, 128  ;;  %p916_p6 = scmp.lt.s32.totalorder %s68_s30, %s68_s30 }
  0x2b   :  { %p912_p5 = scmp.ne.s32.totalorder %s68_s30, %s911_s23  ;;  %p917_p7 = scmp.lt.s32.totalorder %s911_s23, %s911_s23 }
  0x2d   :  { %p918_p8 = por %p917_p7, %p916_p6 }
  0x2f   :  { %p919_p9 = pnand %p918_p8, %p912_p5 }
  0x31   :  { %922 = shalt.err (!%p919_p9)
}
  0x32   :  { %70 = dma.hbm_to_vmem [thread:$0]  %s1185_s10, 128, %s68_s30, [#allocation7]  }
  0x33   :  { %945 = dma.done.wait [#allocation4], 2048  }
  0x34   :  { %946 = vsyncadd [#allocation4], 4294965248 }
  0x35   :  { %947 = dma.done.wait [#allocation7], 2176  }
  0x36   :  { %948 = vsyncadd [#allocation7], 4294965120  ;;  %v956_v0 = vmov 0.0|0.0   ;;  %vm957_vm0 = vmmov 0   ;;  %v958_v1 = vmov 0.0   ;;  %v84_v2 = vld [vmem:[%s1177_s2] sm:$0xff] }
  0x37   :  { %783 = vmatprep.subr.bf16.mxu0 %v956_v0  ;;  %685 = vmatprep.mubr.msk.f32.mxu0 %vm957_vm0, %v958_v1  ;;  %v85_v3 = vld [vmem:[%s1177_s2 + $0x8] sm:$0xff]  ;;  %v86_v4 = vld [vmem:[%s1177_s2 + $0x10] sm:$0xff]  ;;  %v87_v6 = vld [vmem:[%s1177_s2 + $0x18] sm:$0xff]  ;;  %vm100_vm1 = vcmask 1043456   ;;  %vm96_vm2 = vcmask 293888   ;;  %vm345_vm3 = vcmask 1046528  }
  0x38   :  { %789 = vmatprep.subr.bf16.mxu1 %v956_v0  ;;  %698 = vmatprep.mubr.msk.f32.mxu1 %vm957_vm0, %v958_v1  ;;  %v784_v5 = vpack.c.bf16 %v85_v3, %v84_v2  ;;  %v787_v7 = vpack.c.bf16 %v87_v6, %v86_v4  ;;  %v191_v8 = vld [vmem:[%s1180_s5] sm:$0xff]  ;;  %v192_v9 = vld [vmem:[%s1180_s5 + $0x8] sm:$0xff]  ;;  %v193_v13 = vld [vmem:[%s1180_s5 + $0x10] sm:$0xff]  ;;  %vm959_vm4 = vmmov 1   ;;  %vm341_vm6 = vcmask 121856  }
  0x39   :  { %v175_v10 = vld [vmem:[#allocation3] sm:$0xff]  ;;  %v176_v11 = vld [vmem:[#allocation3 + $0x8] sm:$0xff]  ;;  %v790_v12 = vpack.c.bf16 %v192_v9, %v191_v8  ;;  %v194_v14 = vld [vmem:[%s1180_s5 + $0x18] sm:$0xff]  ;;  %vm597_vm7 = vcmask 57344  }
  0x3a   :  { %785 = vmatpush3.bf16.msra.mxu0 %v784_v5  ;;  %v88_v15 = vld [vmem:[%s1177_s2 + $0x20] sm:$0xf]  ;;  %v796_v17 = vpack.c.bf16 %v176_v11, %v175_v10  ;;  %v793_v18 = vpack.c.bf16 %v194_v14, %v193_v13  ;;  %v177_v19 = vld [vmem:[#allocation3 + $0x10] sm:$0xff]  ;;  %v178_v20 = vld [vmem:[#allocation3 + $0x18] sm:$0xff] }
  0x3b   :  { %786 = vmatprep.subr.bf16.mxu0 %v956_v0  ;;  %791 = vmatpush3.bf16.msra.mxu1 %v790_v12  ;;  %v82_v16 = vld [vmem:[%s1175_s0] sm:$0xff]  ;;  %v799_v21 = vpack.c.bf16 %v178_v20, %v177_v19  ;;  %v180_v23 = vld [vmem:[#allocation3 + $0x28] sm:$0xff]  ;;  %v181_v25 = vld [vmem:[#allocation3 + $0x30] sm:$0xff] }
  0x3c   :  { %792 = vmatprep.subr.bf16.mxu1 %v956_v0  ;;  %v179_v22 = vld [vmem:[#allocation3 + $0x20] sm:$0xff]  ;;  %v182_v26 = vld [vmem:[#allocation3 + $0x38] sm:$0xff]  ;;  %v184_v29 = vld [vmem:[#allocation3 + $0x48] sm:$0xff] }
  0x3d   :  { %v802_v24 = vpack.c.bf16 %v180_v23, %v179_v22  ;;  %v805_v27 = vpack.c.bf16 %v182_v26, %v181_v25  ;;  %v183_v28 = vld [vmem:[#allocation3 + $0x40] sm:$0xff]  ;;  %v185_v31 = vld [vmem:[#allocation3 + $0x50] sm:$0xff]  ;;  %v186_v32 = vld [vmem:[#allocation3 + $0x58] sm:$0xff] }
  0x3e   :  { %788 = vmatpush3.bf16.msra.mxu0 %v787_v7  ;;  %v808_v30 = vpack.c.bf16 %v184_v29, %v183_v28  ;;  %v811_v33 = vpack.c.bf16 %v186_v32, %v185_v31  ;;  %v187_v34 = vld [vmem:[#allocation3 + $0x60] sm:$0xff]  ;;  %v188_v35 = vld [vmem:[#allocation3 + $0x68] sm:$0xff]  ;;  %v189_v37 = vld [vmem:[#allocation3 + $0x70] sm:$0xff] }
  0x3f   :  { %683 = vmatprep.subr.mxu0 %v958_v1  ;;  %794 = vmatpush3.bf16.msra.mxu1 %v793_v18  ;;  %v814_v36 = vpack.c.bf16 %v188_v35, %v187_v34  ;;  %v190_v38 = vld [vmem:[#allocation3 + $0x78] sm:$0xff]  ;;  %v195_v39 = vld [vmem:[%s1180_s5 + $0x20] sm:$0xf]  ;;  %v340_v42 = vld [vmem:[%s1181_s6 + $0x8] sm:$0x7f] }
  0x40   :  { %696 = vmatprep.subr.mxu1 %v958_v1  ;;  %v817_v40 = vpack.c.bf16 %v190_v38, %v189_v37  ;;  %v339_v41 = vld [vmem:[%s1181_s6] sm:$0xff]  ;;  %vm821_vm5 = vmpackc.low %vm345_vm3, %vm959_vm4  ;;  %v430_v46 = vld [vmem:[#allocation6 + $0x8] sm:$0xff] }
  0x41   :  { %v820_v43 = vpack.c.bf16 %v340_v42, %v339_v41  ;;  %v83_v44 = vld [vmem:[%s1176_s1] sm:$0xff]  ;;  %v431_v48 = vld [vmem:[#allocation6 + $0x10] sm:$0xff]  ;;  %v432_v49 = vld [vmem:[#allocation6 + $0x18] sm:$0xff] }
  0x42   :  { %684 = vmatpush3.msk.msra.mxu0 %vm100_vm1, %v88_v15  ;;  %v429_v45 = vld [vmem:[#allocation6] sm:$0xff]  ;;  %v827_v50 = vpack.c.bf16 %v432_v49, %v431_v48  ;;  %v434_v52 = vld [vmem:[#allocation6 + $0x28] sm:$0xff]  ;;  %v435_v54 = vld [vmem:[#allocation6 + $0x30] sm:$0xff] }
  0x43   :  { %686 = vmatmul.mubr.msk.f32.vlgmr.msra.gmra.mrb[0].mxu0 %vm96_vm2, %v82_v16  ;;  %795 = vmatprep.subr.bf16.mxu0 %v956_v0  ;;  %v824_v47 = vpack.c.bf16 %v430_v46, %v429_v45  ;;  %v433_v51 = vld [vmem:[#allocation6 + $0x20] sm:$0xff]  ;;  %v436_v55 = vld [vmem:[#allocation6 + $0x38] sm:$0xff]  ;;  %v438_v58 = vld [vmem:[#allocation6 + $0x48] sm:$0xff] }
  0x44   :  { %797 = vmatpush3.bf16.msra.mxu0 %v796_v17  ;;  %733 = vmatprep.mubr.msk.f32.mxu0 %vm957_vm0, %v958_v1  ;;  %v830_v53 = vpack.c.bf16 %v434_v52, %v433_v51  ;;  %v833_v56 = vpack.c.bf16 %v436_v55, %v435_v54  ;;  %v437_v57 = vld [vmem:[#allocation6 + $0x40] sm:$0xff]  ;;  %v439_v60 = vld [vmem:[#allocation6 + $0x50] sm:$0xff]  ;;  %v440_v61 = vld [vmem:[#allocation6 + $0x58] sm:$0xff] }
  0x45   :  { %798 = vmatprep.subr.bf16.mxu0 %v956_v0  ;;  %697 = vmatpush3.msk.msra.mxu1 %vm100_vm1, %v195_v39  ;;  %v836_v59 = vpack.c.bf16 %v438_v58, %v437_v57  ;;  %v839_v62 = vpack.c.bf16 %v440_v61, %v439_v60  ;;  %v615_v63 = vld [vmem:[%s1178_s3] ss:$0 sm:$0xff]  ;;  %v442_v9 = vld [vmem:[#allocation6 + $0x68] sm:$0xff]  ;;  %v443_v13 = vld [vmem:[#allocation6 + $0x70] sm:$0xff] }
  0x46   :  { %699 = vmatmul.mubr.msk.f32.vlgmr.msra.gmra.mrb[0].mxu1 %vm96_vm2, %v82_v16  ;;  %819 = vmatprep.subr.bf16.mxu1 %v956_v0  ;;  %v441_v8 = vld [vmem:[#allocation6 + $0x60] sm:$0xff]  ;;  %v444_v14 = vld [vmem:[#allocation6 + $0x78] sm:$0xff] }
  0x47   :  { %740 = vmatprep.mubr.msk.f32.mxu1 %vm957_vm0, %v958_v1  ;;  %822 = vmatpush3.bf16.msk.msra.mxu1 %vm821_vm5, %v820_v43  ;;  %v842_v10 = vpack.c.bf16 %v442_v9, %v441_v8  ;;  %v845_v15 = vpack.c.bf16 %v444_v14, %v443_v13  ;;  %v623_v22 = vld [vmem:[%s1184_s9] ss:$0 sm:$0xff] }
  0x48   :  { %800 = vmatpush3.bf16.msra.mxu0 %v799_v21  ;;  %823 = vmatprep.subr.bf16.mxu1 %v956_v0  ;;  %v523_v26 = vld [vmem:[#allocation8] sm:$0xff] }
  0x49   :  { %801 = vmatprep.subr.bf16.mxu0 %v956_v0 }
  0x4a   :  { %741 = vmatmul.mubr.msk.f32.vlgmr.msra.gmra.mrb[2].mxu1 %vm341_vm6, %v83_v44 }
  0x4b   :  { %825 = vmatpush3.bf16.msra.mxu1 %v824_v47  ;;  %775 = vmatprep.mubr.msk.f32.mxu1 %vm957_vm0, %v958_v1 }
  0x4c   :  { %803 = vmatpush3.bf16.msra.mxu0 %v802_v24  ;;  %826 = vmatprep.subr.bf16.mxu1 %v956_v0 }
  0x4d   :  { %804 = vmatprep.subr.bf16.mxu0 %v956_v0 }
  0x4f   :  { %828 = vmatpush3.bf16.msra.mxu1 %v827_v50 }
  0x50   :  { %806 = vmatpush3.bf16.msra.mxu0 %v805_v27  ;;  %829 = vmatprep.subr.bf16.mxu1 %v956_v0  ;;  %v595_v27 = vstv %s1186_s11 }
  0x51   :  { %807 = vmatprep.subr.bf16.mxu0 %v956_v0 }
  0x53   :  { %831 = vmatpush3.bf16.msra.mxu1 %v830_v53 }
  0x54   :  { %809 = vmatpush3.bf16.msra.mxu0 %v808_v30  ;;  %832 = vmatprep.subr.bf16.mxu1 %v956_v0 }
  0x55   :  { %810 = vmatprep.subr.bf16.mxu0 %v956_v0 }
  0x57   :  { %834 = vmatpush3.bf16.msra.mxu1 %v833_v56 }
  0x58   :  { %812 = vmatpush3.bf16.msra.mxu0 %v811_v33  ;;  %835 = vmatprep.subr.bf16.mxu1 %v956_v0 }
  0x59   :  { %813 = vmatprep.subr.bf16.mxu0 %v956_v0 }
  0x5b   :  { %837 = vmatpush3.bf16.msra.mxu1 %v836_v59 }
  0x5c   :  { %815 = vmatpush3.bf16.msra.mxu0 %v814_v36  ;;  %838 = vmatprep.subr.bf16.mxu1 %v956_v0 }
  0x5d   :  { %816 = vmatprep.subr.bf16.mxu0 %v956_v0 }
  0x5f   :  { %840 = vmatpush3.bf16.msra.mxu1 %v839_v62 }
  0x60   :  { %818 = vmatpush3.bf16.msra.mxu0 %v817_v40  ;;  %841 = vmatprep.subr.bf16.mxu1 %v956_v0 }
  0x61   :  { %778 = vmatprep.subr.mxu0 %v958_v1 }
  0x63   :  { %843 = vmatpush3.bf16.msra.mxu1 %v842_v10 }
  0x64   :  { %844 = vmatprep.subr.bf16.mxu1 %v956_v0 }
  0x67   :  { %846 = vmatpush3.bf16.msra.mxu1 %v845_v15 }
 0x116   :  { %v170_v2 = vpop.f32.mrb[0].mxu0 }
 0x117   :  { %v171_v3 = vadd.f32 %v615_v63, %v170_v2  ;;  %v687_v4 = vpop.f32.mrb[1].mxu0 }
 0x119   :  { %v174_v5 = vmax.f32 %v171_v3, 0.0  ;;  %v265_v6 = vpop.f32.mrb[0].mxu1 }
 0x11a   :  { %v700_v7 = vpop.f32.mrb[1].mxu1 }
 0x11b   :  { %734 = vmatmul.mubr.f32.vlgmr.msra.gmra.mrb[2].mxu0 %v174_v5 }
 0x11c   :  { %780 = vmatprep.mubr.msk.f32.mxu0 %vm957_vm0, %v958_v1  ;;  %v622_v1 = vld [vmem:[%s1182_s7] ss:$0 sm:$0xff]  ;;  %s960_s7 = smov [#allocation9]  }
 0x11d   :  { %v415_v11 = vpop.f32.mrb[2].mxu1  ;;  %s605_s29 = sshll.u32 %s960_s7, 4  ;;  %s606_s29 = int_to_ptr.vmem [resolvable:$true] %s605_s29 }
 0x11e   :  { %v742_v12 = vpop.f32.mrb[3].mxu1  ;;  %s923_s9 = scalar_lea.vmem %s606_s29, 16  ;;  %s927_s30 = scalar_lea.vmem %s606_s29, 32 }
 0x11f   :  { %p924_p10 = scmp.ne.s32.totalorder %s606_s29, %s923_s9  ;;  %p928_p11 = scmp.lt.s32.totalorder %s606_s29, %s606_s29 }
 0x120   :  { %p929_p12 = scmp.lt.s32.totalorder %s927_s30, %s923_s9 }
 0x122   :  { %p930_p13 = por %p929_p12, %p928_p11 }
 0x124   :  { %p931_p0 = pnand %p930_p13, %p924_p10 }
 0x1ee   :  { %v335_v16 = vpop.f32.mrb[2].mxu0 }
 0x1ef   :  { %v336_v17 = vadd.f32 %v335_v16, %v265_v6  ;;  %v735_v18 = vpop.f32.mrb[3].mxu0 }
 0x1f1   :  { %v419_v19 = vadd.f32 %v415_v11, %v336_v17 }
 0x1f3   :  { %v427_v20 = vadd.f32 %v622_v1, %v419_v19 }
 0x1f5   :  { %v428_v21 = vmax.f32 %v427_v20, 0.0 }
 0x1f7   :  { %776 = vmatmul.mubr.f32.vlgmr.msra.gmra.mrb[4].mxu1 %v428_v21 }
 0x2ca   :  { %v518_v0 = vpop.f32.mrb[4].mxu1 }
 0x2cb   :  { %v519_v23 = vadd.f32 %v623_v22, %v518_v0  ;;  %v777_v24 = vpop.f32.mrb[5].mxu1 }
 0x2cd   :  { %v522_v25 = vmax.f32 %v519_v23, 0.0 }
 0x2cf   :  { %779 = vmatpush3.xpose.msra.mxu0 %v522_v25 }
 0x2d2   :  { %781 = vmatmul.mubr.f32.vlgmr.msra.gmra.mrb[4].mxu0 %v523_v26 }
 0x3a5   :  { %v590_v28 = vpop.f32.mrb[4].mxu0 }
 0x3a6   :  { %v596_v29 = vadd.f32 %v595_v27, %v590_v28  ;;  %v782_v30 = vpop.f32.mrb[5].mxu0 }
 0x3a8   :  { %598 = vst.msk [vmem:[#allocation9] sm:$0x1] %vm597_vm7, %v596_v29 }
 0x3a9   :  { %934 = shalt.err (!%p931_p0)
}
 0x3aa   :  { %s935_s11 = scalar_lea.hbm %s1187_s12, 16 }
 0x3ab   :  { %p936_p1 = scmp.ne.s32.totalorder %s1187_s12, %s935_s11  ;;  %p939_p2 = scmp.lt.u32.totalorder %s935_s11, %s1187_s12 }
 0x3ad   :  { %p941_p3 = pnand %p939_p2, %p936_p1 }
 0x3af   :  { %944 = shalt.err (!%p941_p3)
}
 0x3b0   :  { %608 = dma.vmem_to_hbm [thread:$0]  %s606_s29, 16, %s1187_s12, [#allocation5]  }
 0x3b1   :  { %949 = dma.done.wait [#allocation5], 16  }
 0x3b2   :  { %950 = vsyncadd [#allocation5], 4294967280 }
 0x3b3   :  { %612 = vsyncpa [#allocation4], 1 }
 0x3b4   :  { %613 = vsyncpa [#allocation7], 1 }
 0x3b5   :  { %614 = vsyncpa [#allocation5], 1 }

</bundles_post_ra>
